<compile_context>
chip_gen: v6e
topology: v6e:2x2x1
jax: 0.10.0
libtpu: 0.0.40
codegen_flags: <defaults>
</compile_context>

<pallas_src>
import jax
import jax.numpy as jnp
from jax.experimental import pallas as pl
from jax.experimental.pallas import tpu as pltpu


def _point_trans_feat_kernel(x_ref, w_ref, bias_ref, o_ref):
    # x_ref:    (Bb, Cin, TN)  input tile in NCL layout (points on lanes)
    # w_ref:    (H, Cin)       conv weight with BN scale folded in
    # bias_ref: (H, 1)         folded conv-bias + BN shift
    # o_ref:    (Bb, H, TN)    output tile (lane-dense along N)
    w = w_ref[...]
    bias = bias_ref[...]
    for b in range(o_ref.shape[0]):   # Bb is small & static -> unrolled
        z = jnp.dot(w, x_ref[b], preferred_element_type=jnp.float32)  # (H, TN)
        o_ref[b] = z + bias


def point_trans_feat(x_ncl, conv_w, conv_b, bn_gamma, bn_beta, bn_mean, bn_var,
                     eps=1e-5, tile_n=None):
    """x_ncl: (B, Cin, N) float32 — PyTorch NCL layout.
    Returns (B, H, N) float32, matching PyTorch's output layout."""
    B, Cin, N = x_ncl.shape
    H = conv_w.shape[0]

    # Fold BN (eval mode) + conv bias into one weight and one shift
    # (host-side, tiny (H, Cin) / (H,) ops).
    scale = bn_gamma / jnp.sqrt(bn_var + eps)                       # (H,)
    w_folded = (scale[:, None] * conv_w).astype(jnp.float32)        # (H, Cin)
    bias_folded = (scale * conv_b + bn_beta - scale * bn_mean)      # (H,)
    bias_folded = bias_folded.reshape(H, 1).astype(jnp.float32)

    # --- Tile selection (per-chip) -------------------------------------------
    try:
        kind = jax.devices()[0].device_kind.lower()
    except Exception:  # pragma: no cover - defensive, TPU backend expected
        kind = ""
    if tile_n is None:
        # v5e's lower HBM BW already hides step overhead at 8192; v6e/v7x
        # benefit from 16384.  Worst-case VMEM: ~8 MiB out + ~1 MiB in (x2 buf).
        tile_n = 8192 if "v5" in kind else 16384
    tile_n = max(128, (int(tile_n) // 128) * 128)

    # Point tile: multiple of 128, never larger than needed for this N.
    TN = min(tile_n, ((N + 127) // 128) * 128)
    grid_n = pl.cdiv(N, TN)                 # ragged last tile handled by Pallas

    # Batch tile: keep the per-step output slab large when N is small.
    Bb = max(1, min(B, tile_n // TN))
    while B % Bb:                            # keep Bb an exact divisor of B
        Bb -= 1
    grid_b = B // Bb

    # Megacore / dual-TC sharding: only CORE_PARALLEL changes codegen on v7x.
    dims = ("parallel", "parallel")
    if "v7" in kind and hasattr(pltpu, "CORE_PARALLEL") and grid_n > 1:
        dims = (pltpu.PARALLEL, pltpu.CORE_PARALLEL)

    cost = pl.CostEstimate(
        flops=2 * B * H * Cin * N,
        transcendentals=0,
        bytes_accessed=4 * (B * Cin * N + B * H * N + H * Cin + H),
    )

    out = pl.pallas_call(
        _point_trans_feat_kernel,
        out_shape=jax.ShapeDtypeStruct((B, H, N), jnp.float32),
        grid_spec=pltpu.PrefetchScalarGridSpec(
            num_scalar_prefetch=0,
            grid=(grid_b, grid_n),
            in_specs=[
                pl.BlockSpec((Bb, Cin, TN), lambda b, n: (b, 0, n)),
                pl.BlockSpec((H, Cin), lambda b, n: (0, 0)),
                pl.BlockSpec((H, 1), lambda b, n: (0, 0)),
            ],
            out_specs=pl.BlockSpec((Bb, H, TN), lambda b, n: (b, 0, n)),
        ),
        compiler_params=pltpu.CompilerParams(
            dimension_semantics=dims,
            vmem_limit_bytes=32 * 1024 * 1024,
        ),
        cost_estimate=cost,
    )(x_ncl.astype(jnp.float32), w_folded, bias_folded)

    return out


def _reference(x_ncl, conv_w, conv_b, bn_gamma, bn_beta, bn_mean, bn_var, eps=1e-5):
    # Pure-JAX reference of Conv1d(k=1) + BatchNorm1d (eval mode).
    z = jnp.einsum("oi,bin->bon", conv_w, x_ncl) + conv_b[None, :, None]
    inv = bn_gamma / jnp.sqrt(bn_var + eps)
    return (z - bn_mean[None, :, None]) * inv[None, :, None] + bn_beta[None, :, None]


if __name__ == "__main__":
    # Small shapes consistent with the module: input_dim=3, hidden_d=64.
    # N=200 deliberately exercises the ragged (non-128-multiple) last tile.
    B, Cin, N, H = 2, 3, 200, 64

    key = jax.random.PRNGKey(0)
    k_x, k_w, k_b, k_g, k_be, k_m, k_v = jax.random.split(key, 7)

    x = jax.random.normal(k_x, (B, Cin, N), dtype=jnp.float32)

    # Deterministic synthetic parameters (shapes from PointTransFeat.__init__).
    conv_w = jax.random.normal(k_w, (H, Cin), dtype=jnp.float32) * 0.1   # Conv1d weight (H, Cin, 1) squeezed
    conv_b = jax.random.normal(k_b, (H,), dtype=jnp.float32) * 0.1
    bn_gamma = 1.0 + 0.1 * jax.random.normal(k_g, (H,), dtype=jnp.float32)
    bn_beta = 0.1 * jax.random.normal(k_be, (H,), dtype=jnp.float32)
    bn_mean = 0.1 * jax.random.normal(k_m, (H,), dtype=jnp.float32)
    bn_var = jnp.abs(jax.random.normal(k_v, (H,), dtype=jnp.float32)) + 0.5

    ref = _reference(x, conv_w, conv_b, bn_gamma, bn_beta, bn_mean, bn_var)

    # 1) Default (large-tile) path: single partial tile, Bb=2 batch blocking.
    out = point_trans_feat(x, conv_w, conv_b, bn_gamma, bn_beta, bn_mean, bn_var)
    out = jax.block_until_ready(out)
    assert out.shape == (B, H, N), out.shape
    assert jnp.allclose(out, ref, atol=1e-4, rtol=1e-4), "mismatch vs reference (default tile)"

    # 2) Forced small tile: multiple point tiles with a ragged last tile
    #    (200 = 128 + 72) to verify the masked writeback path.
    out_small = point_trans_feat(x, conv_w, conv_b, bn_gamma, bn_beta, bn_mean,
                                 bn_var, tile_n=128)
    out_small = jax.block_until_ready(out_small)
    assert jnp.allclose(out_small, ref, atol=1e-4, rtol=1e-4), "mismatch vs reference (ragged tiles)"

    print("KERNEL_OK")
</pallas_src>

<mosaic_0001>
module attributes {stable_mosaic.version = 11 : i64} {
  func.func @_point_trans_feat_kernel(%arg0: i32, %arg1: i32, %arg2: memref<2x3x256xf32, #tpu.memory_space<vmem>>, %arg3: memref<64x3xf32, #tpu.memory_space<vmem>>, %arg4: memref<64x1xf32, #tpu.memory_space<vmem>>, %arg5: memref<2x64x256xf32, #tpu.memory_space<vmem>>) attributes {dimension_semantics = [#tpu.dimension_semantics<parallel>, #tpu.dimension_semantics<parallel>], iteration_bounds = array<i64: 1, 1>, scalar_prefetch = 0 : i64, scratch_operands = 0 : i64, tpu.core_type = #tpu.core_type<tc>, window_params = [{transform_indices = @transform_0, window_bounds = array<i64: 2, 3, 256>}, {pipeline_mode = #tpu.pipeline_mode<synchronous>, transform_indices = @transform_1, window_bounds = array<i64: 64, 3>}, {pipeline_mode = #tpu.pipeline_mode<synchronous>, transform_indices = @transform_2, window_bounds = array<i64: 64, 1>}, {transform_indices = @transform_3, window_bounds = array<i64: 2, 64, 256>}]} {
    %c0 = arith.constant 0 : index
    %c0_0 = arith.constant 0 : index
    %0 = vector.load %arg3[%c0, %c0_0] : memref<64x3xf32, #tpu.memory_space<vmem>>, vector<64x3xf32>
    %c0_1 = arith.constant 0 : index
    %c0_2 = arith.constant 0 : index
    %1 = vector.load %arg4[%c0_1, %c0_2] : memref<64x1xf32, #tpu.memory_space<vmem>>, vector<64x1xf32>
    %c0_3 = arith.constant 0 : index
    %c0_4 = arith.constant 0 : index
    %c0_5 = arith.constant 0 : index
    %2 = vector.load %arg2[%c0_3, %c0_4, %c0_5] : memref<2x3x256xf32, #tpu.memory_space<vmem>>, vector<1x3x256xf32>
    %3 = vector.shape_cast %2 : vector<1x3x256xf32> to vector<3x256xf32>
    %cst = arith.constant dense<0.000000e+00> : vector<64x256xf32>
    %4 = tpu.matmul %0, %3, %cst {dimension_numbers = #tpu.dot_dimension_numbers<[1], [0], [0], [1], [0, 0, 1, 1], [], []>} : vector<64x3xf32>, vector<3x256xf32>, vector<64x256xf32> -> vector<64x256xf32>
    %5 = vector.broadcast %1 : vector<64x1xf32> to vector<64x256xf32>
    %6 = arith.addf %4, %5 : vector<64x256xf32>
    %c0_6 = arith.constant 0 : index
    %c0_7 = arith.constant 0 : index
    %c0_8 = arith.constant 0 : index
    %7 = vector.load %arg5[%c0_6, %c0_7, %c0_8] : memref<2x64x256xf32, #tpu.memory_space<vmem>>, vector<1x64x256xf32>
    %8 = vector.shape_cast %7 : vector<1x64x256xf32> to vector<64x256xf32>
    %9 = vector.shape_cast %6 : vector<64x256xf32> to vector<1x64x256xf32>
    tpu.vector_store %arg5[%c0_6, %c0_7, %c0_8], %9 {strides = array<i32>} : memref<2x64x256xf32, #tpu.memory_space<vmem>>, vector<1x64x256xf32>,
    %c1 = arith.constant 1 : index
    %c0_9 = arith.constant 0 : index
    %c0_10 = arith.constant 0 : index
    %10 = vector.load %arg2[%c1, %c0_9, %c0_10] : memref<2x3x256xf32, #tpu.memory_space<vmem>>, vector<1x3x256xf32>
    %11 = vector.shape_cast %10 : vector<1x3x256xf32> to vector<3x256xf32>
    %cst_11 = arith.constant dense<0.000000e+00> : vector<64x256xf32>
    %12 = tpu.matmul %0, %11, %cst_11 {dimension_numbers = #tpu.dot_dimension_numbers<[1], [0], [0], [1], [0, 0, 1, 1], [], []>} : vector<64x3xf32>, vector<3x256xf32>, vector<64x256xf32> -> vector<64x256xf32>
    %13 = vector.broadcast %1 : vector<64x1xf32> to vector<64x256xf32>
    %14 = arith.addf %12, %13 : vector<64x256xf32>
    %c1_12 = arith.constant 1 : index
    %c0_13 = arith.constant 0 : index
    %c0_14 = arith.constant 0 : index
    %15 = vector.load %arg5[%c1_12, %c0_13, %c0_14] : memref<2x64x256xf32, #tpu.memory_space<vmem>>, vector<1x64x256xf32>
    %16 = vector.shape_cast %15 : vector<1x64x256xf32> to vector<64x256xf32>
    %17 = vector.shape_cast %14 : vector<64x256xf32> to vector<1x64x256xf32>
    tpu.vector_store %arg5[%c1_12, %c0_13, %c0_14], %17 {strides = array<i32>} : memref<2x64x256xf32, #tpu.memory_space<vmem>>, vector<1x64x256xf32>,
    return
  }
  func.func @transform_0(%arg0: i32, %arg1: i32) -> (i32, i32, i32) {
    %c0_i32 = arith.constant 0 : i32
    %c0_i32_0 = arith.constant 0 : i32
    return %arg0, %c0_i32, %arg1 : i32, i32, i32
  }
  func.func @transform_1(%arg0: i32, %arg1: i32) -> (i32, i32) {
    %c0_i32 = arith.constant 0 : i32
    %c0_i32_0 = arith.constant 0 : i32
    %c0_i32_1 = arith.constant 0 : i32
    return %c0_i32, %c0_i32_0 : i32, i32
  }
  func.func @transform_2(%arg0: i32, %arg1: i32) -> (i32, i32) {
    %c0_i32 = arith.constant 0 : i32
    %c0_i32_0 = arith.constant 0 : i32
    %c0_i32_1 = arith.constant 0 : i32
    return %c0_i32, %c0_i32_0 : i32, i32
  }
  func.func @transform_3(%arg0: i32, %arg1: i32) -> (i32, i32, i32) {
    %c0_i32 = arith.constant 0 : i32
    %c0_i32_0 = arith.constant 0 : i32
    return %arg0, %c0_i32, %arg1 : i32, i32, i32
  }
}

</mosaic_0001>

<bundles_post_ra>
// kernel: tpu_custom_call.1
= control target key start
LH: loop header
LB: loop body
LE: loop exit
PB: predicated region body
PF: predicated region fallthrough
CT: control target
= control target key end

     0   :  { %vm99_vm0 = vcmask 1042432   ;;  %v439_v4 = vmov 0.0   ;;  %vm74_vm1 = vcmask 23552   ;;  %v440_v6 = vmov 0   ;;  %s537_s0 = inlined_call_operand.vmem [shape: f32[2,3,200], index: 0, kind: input, shape index: {}]   ;;  %s538_s1 = inlined_call_operand.vmem [shape: f32[64,3], index: 1, kind: input, shape index: {}]   ;;  %s539_s2 = inlined_call_operand.vmem [shape: f32[64,1], index: 2, kind: input, shape index: {}]   ;;  %s540_s3 = inlined_call_operand.hbm [shape: f32[2,64,200], index: 3, kind: output, shape index: {}]  }
   0x1   :  { %v31_v0 = vld [vmem:[%s537_s0] sm:$0x77]  ;;  %v397_v1 = vld [vmem:[%s537_s0 + $0x8] sm:$0x77]  ;;  %168 = vmatprep.mubr.f32.mxu0 %v439_v4  ;;  %305 = vmatprep.mubr.f32.mxu1 %v439_v4  ;;  %v25_v8 = vld [vmem:[%s539_s2 + $0x10] sm:$0xff] }
   0x2   :  { %v73_v2 = vcombine.high %v31_v0, %v31_v0  ;;  %v236_v3 = vcombine.high %v397_v1, %v397_v1  ;;  %v15_v5 = vld [vmem:[%s538_s1] sm:$0xff]  ;;  %413 = vset.pattern.permute.xlu0 %v440_v6  ;;  %414 = vset.pattern.permute.xlu1 %v440_v6  ;;  %v16_v9 = vld [vmem:[%s538_s1 + $0x8] sm:$0xff] }
   0x3   :  { %v23_v7 = vld [vmem:[%s539_s2] sm:$0xff] }
   0x4   :  { %387 = vmatprep.subr.msk.mxu0 %vm99_vm0, %v73_v2  ;;  %398 = vmatprep.subr.msk.mxu1 %vm99_vm0, %v236_v3 }
   0x5   :  { %388 = vmatpush1.msk.msra.mxu0 %vm99_vm0, %v31_v0  ;;  %399 = vmatpush1.msk.msra.mxu1 %vm99_vm0, %v397_v1 }
   0x6   :  { %389 = vmatmul.mubr.msk.f32.vlgmr.msra.gmra.mxu0 %vm74_vm1, %v15_v5  ;;  %400 = vmatmul.mubr.msk.f32.vlgmr.msra.gmra.mxu1 %vm74_vm1, %v15_v5 }
   0x7   :  { %174 = vmatprep.mubr.f32.mxu0 %v439_v4  ;;  %311 = vmatprep.mubr.f32.mxu1 %v439_v4 }
   0x8   :  { %8 = vsyncpa [#allocation3], 0  ;;  %34 = vperm.xlu0 %413, %v23_v7   ;;  %44 = vperm.xlu1 %414, %v25_v8   ;;  %v24_v10 = vld [vmem:[%s539_s2 + $0x8] sm:$0xff]  ;;  %v26_v11 = vld [vmem:[%s539_s2 + $0x18] sm:$0xff] }
   0x9   :  { %v17_v12 = vld [vmem:[%s538_s1 + $0x10] sm:$0xff]  ;;  %v28_v13 = vld [vmem:[%s539_s2 + $0x28] sm:$0xff]  ;;  %v27_v14 = vld [vmem:[%s539_s2 + $0x20] sm:$0xff] }
   0xa   :  { %390 = vmatmul.mubr.msk.f32.gmra.mxu0 %vm74_vm1, %v16_v9  ;;  %401 = vmatmul.mubr.msk.f32.gmra.mxu1 %vm74_vm1, %v16_v9  ;;  %v18_v15 = vld [vmem:[%s538_s1 + $0x18] sm:$0xff]  ;;  %v29_v17 = vld [vmem:[%s539_s2 + $0x30] sm:$0xff]  ;;  %v19_v18 = vld [vmem:[%s538_s1 + $0x20] sm:$0xff] }
   0xb   :  { %180 = vmatprep.mubr.f32.mxu0 %v439_v4  ;;  %317 = vmatprep.mubr.f32.mxu1 %v439_v4  ;;  %v30_v16 = vld [vmem:[%s539_s2 + $0x38] sm:$0xff]  ;;  %v20_v19 = vld [vmem:[%s538_s1 + $0x28] sm:$0xff]  ;;  %v21_v20 = vld [vmem:[%s538_s1 + $0x30] sm:$0xff] }
   0xc   :  { %39 = vperm.xlu0 %413, %v24_v10   ;;  %49 = vperm.xlu1 %414, %v26_v11   ;;  %v22_v21 = vld [vmem:[%s538_s1 + $0x38] sm:$0xff]  ;;  %s441_s1 = smov [#allocation2]  }
   0xd   :  { %s376_s19 = sshll.u32 %s441_s1, 4  ;;  %s377_s19 = int_to_ptr.vmem [resolvable:$true] %s376_s19 }
   0xe   :  { %391 = vmatmul.mubr.msk.f32.gmra.mxu0 %vm74_vm1, %v17_v12  ;;  %402 = vmatmul.mubr.msk.f32.gmra.mxu1 %vm74_vm1, %v17_v12  ;;  %s417_s0 = scalar_lea.vmem %s377_s19, 4096  ;;  %p422_p1 = scmp.lt.s32.totalorder %s377_s19, %s377_s19 }
   0xf   :  { %186 = vmatprep.mubr.f32.mxu0 %v439_v4  ;;  %323 = vmatprep.mubr.f32.mxu1 %v439_v4  ;;  %p418_p0 = scmp.ne.s32.totalorder %s377_s19, %s417_s0  ;;  %p423_p2 = scmp.lt.s32.totalorder %s417_s0, %s417_s0 }
  0x10   :  { %59 = vperm.xlu1 %414, %v28_v13   ;;  %54 = vperm.xlu0 %413, %v27_v14  }
  0x11   :  { %p424_p3 = por %p423_p2, %p422_p1 }
  0x12   :  { %392 = vmatmul.mubr.msk.f32.gmra.mxu0 %vm74_vm1, %v18_v15  ;;  %403 = vmatmul.mubr.msk.f32.gmra.mxu1 %vm74_vm1, %v18_v15 }
  0x13   :  { %192 = vmatprep.mubr.f32.mxu0 %v439_v4  ;;  %329 = vmatprep.mubr.f32.mxu1 %v439_v4  ;;  %p425_p4 = pnand %p424_p3, %p418_p0 }
  0x14   :  { %69 = vperm.xlu1 %414, %v30_v16   ;;  %64 = vperm.xlu0 %413, %v29_v17  }
  0x16   :  { %393 = vmatmul.mubr.msk.f32.gmra.mxu0 %vm74_vm1, %v19_v18  ;;  %404 = vmatmul.mubr.msk.f32.gmra.mxu1 %vm74_vm1, %v19_v18 }
  0x17   :  { %198 = vmatprep.mubr.f32.mxu0 %v439_v4  ;;  %335 = vmatprep.mubr.f32.mxu1 %v439_v4 }
  0x1a   :  { %394 = vmatmul.mubr.msk.f32.gmra.mxu0 %vm74_vm1, %v20_v19  ;;  %405 = vmatmul.mubr.msk.f32.gmra.mxu1 %vm74_vm1, %v20_v19 }
  0x1b   :  { %204 = vmatprep.mubr.f32.mxu0 %v439_v4  ;;  %341 = vmatprep.mubr.f32.mxu1 %v439_v4 }
  0x1e   :  { %395 = vmatmul.mubr.msk.f32.gmra.mxu0 %vm74_vm1, %v21_v20  ;;  %406 = vmatmul.mubr.msk.f32.gmra.mxu1 %vm74_vm1, %v21_v20 }
  0x1f   :  { %210 = vmatprep.mubr.f32.mxu0 %v439_v4  ;;  %347 = vmatprep.mubr.f32.mxu1 %v439_v4 }
  0x22   :  { %396 = vmatmul.mubr.msk.f32.gmra.mxu0 %vm74_vm1, %v22_v21  ;;  %407 = vmatmul.mubr.msk.f32.gmra.mxu1 %vm74_vm1, %v22_v21 }
  0x83   :  { %v35_v22 = vpop.permute.xlu0 %34  ;;  %v45_v36 = vpop.permute.xlu1 %44 }
  0x87   :  { %v40_v27 = vpop.permute.xlu0 %39  ;;  %v50_v47 = vpop.permute.xlu1 %49 }
  0x8b   :  { %v55_v56 = vpop.permute.xlu0 %54  ;;  %v60_v1 = vpop.permute.xlu1 %59 }
  0x8f   :  { %v65_v10 = vpop.permute.xlu0 %64  ;;  %v70_v19 = vpop.permute.xlu1 %69 }
  0xc6   :  { %v170_v23 = vpop.f32.mrf.mxu0  ;;  %v307_v24 = vpop.f32.mrf.mxu1 }
  0xc7   :  { %v171_v25 = vadd.f32 %v170_v23, %v35_v22  ;;  %v308_v26 = vadd.f32 %v307_v24, %v35_v22 }
  0xc8   :  { %v172_v28 = vpop.f32.mrf.mxu0  ;;  %v309_v29 = vpop.f32.mrf.mxu1 }
  0xc9   :  { %217 = vst [vmem:[#allocation2] sm:$0xff] %v171_v25  ;;  %355 = vst [vmem:[#allocation2 + $0x80] sm:$0xff] %v308_v26  ;;  %v173_v30 = vadd.f32 %v172_v28, %v35_v22  ;;  %v310_v31 = vadd.f32 %v309_v29, %v35_v22 }
  0xca   :  { %v176_v32 = vpop.f32.mrf.mxu0  ;;  %v313_v33 = vpop.f32.mrf.mxu1 }
  0xcb   :  { %218 = vst [vmem:[#allocation2 + $0x8] sm:$0xff] %v173_v30  ;;  %356 = vst [vmem:[#allocation2 + $0x88] sm:$0xff] %v310_v31  ;;  %v177_v34 = vadd.f32 %v176_v32, %v40_v27  ;;  %v314_v35 = vadd.f32 %v313_v33, %v40_v27 }
  0xcc   :  { %v178_v37 = vpop.f32.mrf.mxu0  ;;  %v315_v38 = vpop.f32.mrf.mxu1 }
  0xcd   :  { %219 = vst [vmem:[#allocation2 + $0x10] sm:$0xff] %v177_v34  ;;  %357 = vst [vmem:[#allocation2 + $0x90] sm:$0xff] %v314_v35  ;;  %v179_v39 = vadd.f32 %v178_v37, %v40_v27  ;;  %v316_v40 = vadd.f32 %v315_v38, %v40_v27 }
  0xce   :  { %v182_v41 = vpop.f32.mrf.mxu0  ;;  %v319_v42 = vpop.f32.mrf.mxu1 }
  0xcf   :  { %220 = vst [vmem:[#allocation2 + $0x18] sm:$0xff] %v179_v39  ;;  %358 = vst [vmem:[#allocation2 + $0x98] sm:$0xff] %v316_v40  ;;  %v183_v43 = vadd.f32 %v182_v41, %v45_v36  ;;  %v320_v44 = vadd.f32 %v319_v42, %v45_v36 }
  0xd0   :  { %v184_v45 = vpop.f32.mrf.mxu0  ;;  %v321_v46 = vpop.f32.mrf.mxu1 }
  0xd1   :  { %221 = vst [vmem:[#allocation2 + $0x20] sm:$0xff] %v183_v43  ;;  %359 = vst [vmem:[#allocation2 + $0xa0] sm:$0xff] %v320_v44  ;;  %v185_v48 = vadd.f32 %v184_v45, %v45_v36  ;;  %v322_v49 = vadd.f32 %v321_v46, %v45_v36 }
  0xd2   :  { %v188_v50 = vpop.f32.mrf.mxu0  ;;  %v325_v51 = vpop.f32.mrf.mxu1 }
  0xd3   :  { %222 = vst [vmem:[#allocation2 + $0x28] sm:$0xff] %v185_v48  ;;  %360 = vst [vmem:[#allocation2 + $0xa8] sm:$0xff] %v322_v49  ;;  %v189_v52 = vadd.f32 %v188_v50, %v50_v47  ;;  %v326_v53 = vadd.f32 %v325_v51, %v50_v47 }
  0xd4   :  { %v190_v54 = vpop.f32.mrf.mxu0  ;;  %v327_v55 = vpop.f32.mrf.mxu1 }
  0xd5   :  { %223 = vst [vmem:[#allocation2 + $0x30] sm:$0xff] %v189_v52  ;;  %361 = vst [vmem:[#allocation2 + $0xb0] sm:$0xff] %v326_v53  ;;  %v191_v57 = vadd.f32 %v190_v54, %v50_v47  ;;  %v328_v58 = vadd.f32 %v327_v55, %v50_v47 }
  0xd6   :  { %v194_v59 = vpop.f32.mrf.mxu0  ;;  %v331_v60 = vpop.f32.mrf.mxu1 }
  0xd7   :  { %224 = vst [vmem:[#allocation2 + $0x38] sm:$0xff] %v191_v57  ;;  %362 = vst [vmem:[#allocation2 + $0xb8] sm:$0xff] %v328_v58  ;;  %v195_v61 = vadd.f32 %v194_v59, %v55_v56  ;;  %v332_v62 = vadd.f32 %v331_v60, %v55_v56 }
  0xd8   :  { %v196_v63 = vpop.f32.mrf.mxu0  ;;  %v333_v0 = vpop.f32.mrf.mxu1 }
  0xd9   :  { %225 = vst [vmem:[#allocation2 + $0x40] sm:$0xff] %v195_v61  ;;  %363 = vst [vmem:[#allocation2 + $0xc0] sm:$0xff] %v332_v62  ;;  %v197_v2 = vadd.f32 %v196_v63, %v55_v56  ;;  %v334_v3 = vadd.f32 %v333_v0, %v55_v56 }
  0xda   :  { %v200_v4 = vpop.f32.mrf.mxu0  ;;  %v337_v5 = vpop.f32.mrf.mxu1 }
  0xdb   :  { %226 = vst [vmem:[#allocation2 + $0x48] sm:$0xff] %v197_v2  ;;  %364 = vst [vmem:[#allocation2 + $0xc8] sm:$0xff] %v334_v3  ;;  %v201_v6 = vadd.f32 %v200_v4, %v60_v1  ;;  %v338_v7 = vadd.f32 %v337_v5, %v60_v1 }
  0xdc   :  { %v202_v8 = vpop.f32.mrf.mxu0  ;;  %v339_v9 = vpop.f32.mrf.mxu1 }
  0xdd   :  { %227 = vst [vmem:[#allocation2 + $0x50] sm:$0xff] %v201_v6  ;;  %365 = vst [vmem:[#allocation2 + $0xd0] sm:$0xff] %v338_v7  ;;  %v203_v11 = vadd.f32 %v202_v8, %v60_v1  ;;  %v340_v12 = vadd.f32 %v339_v9, %v60_v1 }
  0xde   :  { %v206_v13 = vpop.f32.mrf.mxu0  ;;  %v343_v14 = vpop.f32.mrf.mxu1 }
  0xdf   :  { %228 = vst [vmem:[#allocation2 + $0x58] sm:$0xff] %v203_v11  ;;  %366 = vst [vmem:[#allocation2 + $0xd8] sm:$0xff] %v340_v12  ;;  %v207_v15 = vadd.f32 %v206_v13, %v65_v10  ;;  %v344_v16 = vadd.f32 %v343_v14, %v65_v10 }
  0xe0   :  { %v208_v17 = vpop.f32.mrf.mxu0  ;;  %v345_v18 = vpop.f32.mrf.mxu1 }
  0xe1   :  { %229 = vst [vmem:[#allocation2 + $0x60] sm:$0xff] %v207_v15  ;;  %367 = vst [vmem:[#allocation2 + $0xe0] sm:$0xff] %v344_v16  ;;  %v209_v20 = vadd.f32 %v208_v17, %v65_v10  ;;  %v346_v21 = vadd.f32 %v345_v18, %v65_v10 }
  0xe2   :  { %v212_v22 = vpop.f32.mrf.mxu0  ;;  %v349_v23 = vpop.f32.mrf.mxu1 }
  0xe3   :  { %230 = vst [vmem:[#allocation2 + $0x68] sm:$0xff] %v209_v20  ;;  %368 = vst [vmem:[#allocation2 + $0xe8] sm:$0xff] %v346_v21  ;;  %v213_v24 = vadd.f32 %v212_v22, %v70_v19  ;;  %v350_v25 = vadd.f32 %v349_v23, %v70_v19 }
  0xe4   :  { %v214_v26 = vpop.f32.mrf.mxu0  ;;  %v351_v27 = vpop.f32.mrf.mxu1 }
  0xe5   :  { %231 = vst [vmem:[#allocation2 + $0x70] sm:$0xff] %v213_v24  ;;  %369 = vst [vmem:[#allocation2 + $0xf0] sm:$0xff] %v350_v25  ;;  %v215_v28 = vadd.f32 %v214_v26, %v70_v19  ;;  %v352_v29 = vadd.f32 %v351_v27, %v70_v19 }
  0xe7   :  { %232 = vst [vmem:[#allocation2 + $0x78] sm:$0xff] %v215_v28  ;;  %370 = vst [vmem:[#allocation2 + $0xf8] sm:$0xff] %v352_v29 }
  0xe8   :  { %428 = shalt.err (!%p425_p4)
}
  0xe9   :  { %s442_s20 = smov 256   ;;  %s443_s21 = smov 16  }
  0xea   :  { %382 = dma.vmem_to_hbm [thread:$0]  %s377_s19, 4096, %s540_s3, [#allocation3], %s442_s20, %s442_s20, %s443_s21  }
  0xeb   :  { %437 = dma.done.wait [#allocation3], 4096  }
  0xec   :  { %438 = vsyncadd [#allocation3], 4294963200 }
  0xed   :  { %386 = vsyncpa [#allocation3], 1 }

</bundles_post_ra>
